<compile_context>
chip_gen: v5e
topology: v5e:2x2
jax: 0.10.0
libtpu: 0.0.40
codegen_flags: <defaults>
</compile_context>

<pallas_src>
import math

import jax
import jax.numpy as jnp
from jax.experimental import pallas as pl
from jax.experimental.pallas import tpu as pltpu

_PER_SET_BUDGET = 6 * 1024 * 1024    # one buffered set: all input blocks + output block
_VMEM_LIMIT = 32 * 1024 * 1024       # explicit scoped-VMEM request (<= v7x 64 MiB physical)
_MIN_GRID = 8                        # target total program count (pipelining / megacore)


def _round_down(x, m):
    return (x // m) * m


def _make_concat_kernel(sizes, axis):
    """Kernel that copies each input block into a static slice of the output block.

    axis == 1  -> 3-D blocks, concat offsets on the sublane (second-to-last) axis.
    axis == -1 -> 2-D blocks, concat offsets on the lane (last) axis.
    """
    offsets = []
    off = 0
    for s in sizes:
        offsets.append(off)
        off += s

    def kernel(*refs):
        out_ref = refs[-1]
        for in_ref, o, s in zip(refs[:-1], offsets, sizes):
            if axis == 1:
                out_ref[:, o:o + s, :] = in_ref[...]
            else:
                out_ref[:, o:o + s] = in_ref[...]

    return kernel


def _choose_trail_tile(trail, c_total, itemsize, lead):
    """Last-dim (lane) tile: a multiple of 128 (or the full trail), bounded by the
    VMEM budget, with enough total grid steps for pipelining / megacore."""
    col_bytes = 2 * c_total * itemsize                       # output col + all input cols
    max_cols = max(128, _round_down(_PER_SET_BUDGET // col_bytes, 128))

    if trail % 128 != 0:
        # Full-extent last dim is always a legal block; only tile (accepting a
        # masked edge block) when the full trail would blow the budget.
        if trail * col_bytes <= _PER_SET_BUDGET or trail < 128:
            return trail
        return max(128, min(max_cols, _round_down(trail, 128)))

    # Lane-aligned trail: any multiple-of-128 tile is legal & lane-dense.
    want_steps = -(-_MIN_GRID // max(lead, 1))               # ceil(_MIN_GRID / lead)
    desired = max(128, _round_down(trail // want_steps, 128))
    tile = min(trail, max_cols, desired)
    # Prefer a tile that divides trail exactly (no masked edge block).
    t = tile
    while t > 128 and trail % t:
        t -= 128
    return t if trail % t == 0 else tile


def _choose_lead_tile(lead, c_total, tile_trail, n_trail, itemsize):
    """Leading-dim tile: budget-bounded, keeps >= _MIN_GRID total programs."""
    set_bytes = 2 * c_total * tile_trail * itemsize          # per unit of lead
    by_budget = max(1, _PER_SET_BUDGET // max(set_bytes, 1))
    need_lead_steps = max(1, -(-_MIN_GRID // max(n_trail, 1)))
    by_grid = max(1, lead // need_lead_steps)
    cap = max(1, min(lead, by_budget, by_grid))
    # Prefer an exact divisor of lead (no masked edge block); bounded search.
    for t in range(cap, max(0, cap - 64), -1):
        if t >= 1 and lead % t == 0:
            return t
    return cap


def concat(xs, dimension=1):
    """Pallas equivalent of torch.cat(xs, dim=dimension)."""
    xs = list(xs)
    assert len(xs) >= 1, "concat needs at least one input"
    ndim = xs[0].ndim
    d = dimension % ndim
    base = xs[0].shape
    for x in xs:
        assert x.ndim == ndim
        assert x.shape[:d] == base[:d] and x.shape[d + 1:] == base[d + 1:], (
            "all concat inputs must match on non-concat dims")

    # torch.cat-style dtype promotion across inputs.
    dtype = jnp.result_type(*[x.dtype for x in xs])
    xs = [x.astype(dtype) for x in xs]
    itemsize = jnp.dtype(dtype).itemsize

    lead = math.prod(base[:d])
    trail = math.prod(base[d + 1:])
    sizes = [x.shape[d] for x in xs]
    c_total = sum(sizes)
    out_shape = base[:d] + (c_total,) + base[d + 1:]
    total_bytes = 2 * lead * c_total * trail * itemsize      # read everything + write output
    cost = pl.CostEstimate(flops=0, transcendentals=0, bytes_accessed=total_bytes)

    if trail > 1:
        # --- 3-D path: concat offsets on the sublane axis, lanes stay dense. ---
        # TODO(synk): pathological case (c_total * 128 elems alone exceeding the
        # VMEM budget) would also need tiling of the concat axis itself.
        x3d = [x.reshape(lead, c, trail) for x, c in zip(xs, sizes)]
        tile_trail = _choose_trail_tile(trail, c_total, itemsize, lead)
        n_trail = pl.cdiv(trail, tile_trail)
        tile_lead = _choose_lead_tile(lead, c_total, tile_trail, n_trail, itemsize)
        n_lead = pl.cdiv(lead, tile_lead)

        out3d = pl.pallas_call(
            _make_concat_kernel(sizes, axis=1),
            out_shape=jax.ShapeDtypeStruct((lead, c_total, trail), dtype),
            grid=(n_lead, n_trail),
            in_specs=[pl.BlockSpec((tile_lead, c, tile_trail), lambda i, j: (i, 0, j))
                      for c in sizes],
            out_specs=pl.BlockSpec((tile_lead, c_total, tile_trail),
                                   lambda i, j: (i, 0, j)),
            compiler_params=pltpu.CompilerParams(
                dimension_semantics=("parallel", "parallel"),
                vmem_limit_bytes=_VMEM_LIMIT),
            cost_estimate=cost,
        )(*x3d)
        return out3d.reshape(out_shape)

    # --- 2-D fallback: concat on the last axis (lane offsets may be unaligned,
    # correct but slower; only hit when there are no trailing dims). ---
    widths = sizes
    total_w = c_total
    x2d = [x.reshape(lead, w) for x, w in zip(xs, widths)]
    row_set_bytes = 2 * total_w * itemsize
    mult = max(8, 32 // itemsize)                            # 8 f32 / 16 bf16 / 32 int8
    if lead <= mult:
        tile_r = lead                                        # full-extent block is legal
    else:
        by_budget = max(mult, _round_down(_PER_SET_BUDGET // max(row_set_bytes, 1), mult))
        by_grid = (max(mult, _round_down(lead // _MIN_GRID, mult))
                   if lead >= _MIN_GRID * mult else mult)
        tile_r = max(mult, min(_round_down(lead, mult), by_budget, by_grid))

    out2d = pl.pallas_call(
        _make_concat_kernel(widths, axis=-1),
        out_shape=jax.ShapeDtypeStruct((lead, total_w), dtype),
        grid=(pl.cdiv(lead, tile_r),),
        in_specs=[pl.BlockSpec((tile_r, w), lambda i: (i, 0)) for w in widths],
        out_specs=pl.BlockSpec((tile_r, total_w), lambda i: (i, 0)),
        compiler_params=pltpu.CompilerParams(
            dimension_semantics=("parallel",),
            vmem_limit_bytes=_VMEM_LIMIT),
        cost_estimate=cost,
    )(*x2d)
    return out2d.reshape(out_shape)


if __name__ == "__main__":
    key = jax.random.PRNGKey(0)
    k1, k2, k3, k4, k5 = jax.random.split(key, 5)

    # 1) Default Concat (d=1): NCHW channel concat, f32 (3-D sublane path).
    x1 = jax.random.normal(k1, (2, 4, 16, 16), dtype=jnp.float32)
    x2 = jax.random.normal(k2, (2, 6, 16, 16), dtype=jnp.float32)
    x3 = jax.random.normal(k3, (2, 2, 16, 16), dtype=jnp.float32)
    y = concat([x1, x2, x3], dimension=1)
    jax.block_until_ready(y)
    ref = jnp.concatenate([x1, x2, x3], axis=1)
    assert y.shape == ref.shape and y.dtype == ref.dtype
    assert bool(jnp.array_equal(y, ref))

    # 2) bf16 channel concat (packed-dtype path).
    xb1 = x1.astype(jnp.bfloat16)
    xb2 = x2.astype(jnp.bfloat16)
    yb = concat([xb1, xb2], dimension=1)
    jax.block_until_ready(yb)
    refb = jnp.concatenate([xb1, xb2], axis=1)
    assert yb.shape == refb.shape and yb.dtype == refb.dtype
    assert bool(jnp.array_equal(yb, refb))

    # 3) Last-dim concat with unaligned widths (2-D fallback path).
    z1 = jax.random.normal(k4, (2, 8, 33), dtype=jnp.float32)
    z2 = jax.random.normal(k5, (2, 8, 31), dtype=jnp.float32)
    yz = concat([z1, z2], dimension=2)
    jax.block_until_ready(yz)
    refz = jnp.concatenate([z1, z2], axis=2)
    assert yz.shape == refz.shape and yz.dtype == refz.dtype
    assert bool(jnp.array_equal(yz, refz))

    print("KERNEL_OK")
</pallas_src>

<mosaic_0001>
module attributes {stable_mosaic.version = 11 : i64} {
  func.func @kernel(%arg0: i32, %arg1: i32, %arg2: memref<1x4x128xf32, #tpu.memory_space<vmem>>, %arg3: memref<1x6x128xf32, #tpu.memory_space<vmem>>, %arg4: memref<1x2x128xf32, #tpu.memory_space<vmem>>, %arg5: memref<1x12x128xf32, #tpu.memory_space<vmem>>) attributes {dimension_semantics = [#tpu.dimension_semantics<parallel>, #tpu.dimension_semantics<parallel>], iteration_bounds = array<i64: 2, 2>, scalar_prefetch = 0 : i64, scratch_operands = 0 : i64, tpu.core_type = #tpu.core_type<tc>, window_params = [{transform_indices = @transform_0, window_bounds = array<i64: 1, 4, 128>}, {transform_indices = @transform_1, window_bounds = array<i64: 1, 6, 128>}, {transform_indices = @transform_2, window_bounds = array<i64: 1, 2, 128>}, {transform_indices = @transform_3, window_bounds = array<i64: 1, 12, 128>}]} {
    %c0 = arith.constant 0 : index
    %c0_0 = arith.constant 0 : index
    %c0_1 = arith.constant 0 : index
    %0 = vector.load %arg2[%c0, %c0_0, %c0_1] : memref<1x4x128xf32, #tpu.memory_space<vmem>>, vector<1x4x128xf32>
    %c0_2 = arith.constant 0 : index
    %c0_3 = arith.constant 0 : index
    %c0_4 = arith.constant 0 : index
    %1 = vector.load %arg5[%c0_2, %c0_3, %c0_4] : memref<1x12x128xf32, #tpu.memory_space<vmem>>, vector<1x4x128xf32>
    tpu.vector_store %arg5[%c0_2, %c0_3, %c0_4], %0 {strides = array<i32>} : memref<1x12x128xf32, #tpu.memory_space<vmem>>, vector<1x4x128xf32>,
    %c0_5 = arith.constant 0 : index
    %c0_6 = arith.constant 0 : index
    %c0_7 = arith.constant 0 : index
    %2 = vector.load %arg3[%c0_5, %c0_6, %c0_7] : memref<1x6x128xf32, #tpu.memory_space<vmem>>, vector<1x6x128xf32>
    %c0_8 = arith.constant 0 : index
    %c4 = arith.constant 4 : index
    %c0_9 = arith.constant 0 : index
    %3 = vector.load %arg5[%c0_8, %c4, %c0_9] : memref<1x12x128xf32, #tpu.memory_space<vmem>>, vector<1x6x128xf32>
    tpu.vector_store %arg5[%c0_8, %c4, %c0_9], %2 {strides = array<i32>} : memref<1x12x128xf32, #tpu.memory_space<vmem>>, vector<1x6x128xf32>,
    %c0_10 = arith.constant 0 : index
    %c0_11 = arith.constant 0 : index
    %c0_12 = arith.constant 0 : index
    %4 = vector.load %arg4[%c0_10, %c0_11, %c0_12] : memref<1x2x128xf32, #tpu.memory_space<vmem>>, vector<1x2x128xf32>
    %c0_13 = arith.constant 0 : index
    %c10 = arith.constant 10 : index
    %c0_14 = arith.constant 0 : index
    %5 = vector.load %arg5[%c0_13, %c10, %c0_14] : memref<1x12x128xf32, #tpu.memory_space<vmem>>, vector<1x2x128xf32>
    tpu.vector_store %arg5[%c0_13, %c10, %c0_14], %4 {strides = array<i32>} : memref<1x12x128xf32, #tpu.memory_space<vmem>>, vector<1x2x128xf32>,
    return
  }
  func.func @transform_0(%arg0: i32, %arg1: i32) -> (i32, i32, i32) {
    %c0_i32 = arith.constant 0 : i32
    %c0_i32_0 = arith.constant 0 : i32
    return %arg0, %c0_i32, %arg1 : i32, i32, i32
  }
  func.func @transform_1(%arg0: i32, %arg1: i32) -> (i32, i32, i32) {
    %c0_i32 = arith.constant 0 : i32
    %c0_i32_0 = arith.constant 0 : i32
    return %arg0, %c0_i32, %arg1 : i32, i32, i32
  }
  func.func @transform_2(%arg0: i32, %arg1: i32) -> (i32, i32, i32) {
    %c0_i32 = arith.constant 0 : i32
    %c0_i32_0 = arith.constant 0 : i32
    return %arg0, %c0_i32, %arg1 : i32, i32, i32
  }
  func.func @transform_3(%arg0: i32, %arg1: i32) -> (i32, i32, i32) {
    %c0_i32 = arith.constant 0 : i32
    %c0_i32_0 = arith.constant 0 : i32
    return %arg0, %c0_i32, %arg1 : i32, i32, i32
  }
}

</mosaic_0001>

<bundles_post_ra>
// kernel: tpu_custom_call.1
= control target key start
LH: loop header
LB: loop body
LE: loop exit
PB: predicated region body
PF: predicated region fallthrough
CT: control target
= control target key end

     0   :  { %s561_s12 = smov 0   ;;  %s563_s13 = smov 0   ;;  %s662_s0 = inlined_call_operand.vmem [shape: f32[2,4,256], index: 0, kind: input, shape index: {}]   ;;  %s663_s1 = inlined_call_operand.vmem [shape: f32[2,6,256], index: 1, kind: input, shape index: {}]   ;;  %s664_s2 = inlined_call_operand.vmem [shape: f32[2,2,256], index: 2, kind: input, shape index: {}]   ;;  %s665_s3 = inlined_call_operand.vmem [shape: f32[2,12,256], index: 3, kind: output, shape index: {}]  }
   0x1   :  { %s565_s14 = smov 0   ;;  %s567_s15 = smov 0  }
   0x2   :  { %s569_s16 = smov 0   ;;  %s571_s17 = smov 0  }
   0x3   :  { %s573_s18 = smov 0  }
   0x4 LB: > { %s22_s19 = sadd.s32 1, %s531_s16  ;;  %s25_s20 = sadd.s32 1, %s535_s17  ;;  %s539_s18 = sphi %s573_s18, %s13_s18   ;;  %s535_s17 = sphi %s571_s17, %s672_s17   ;;  %s531_s16 = sphi %s569_s16, %s671_s16   ;;  %s527_s15 = sphi %s567_s15, %s670_s15   ;;  %s523_s14 = sphi %s565_s14, %s669_s14   ;;  %s519_s13 = sphi %s563_s13, %s668_s13   ;;  %s515_s12 = sphi %s561_s12, %s667_s12  }
   0x5   : > { %p23_p0 = scmp.ge.s32.totalorder %s22_s19, 2  ;;  %s412_s21 = sadd.s32 4294967295, %s539_s18  }
   0x6   : > { %p128_p1 = scmp.ne.s32.totalorder %s519_s13, %s515_s12  ;;  %p129_p2 = scmp.eq.s32.totalorder %s412_s21, 3 }
   0x7   : > { %s674_s19 = smov (%p23_p0, %s22_s19), 0  ;;  %s676_s20 = smov (!%p23_p0, %s25_s20), %s535_s17 }
   0x8   : > { %s114_s22 = ssub.s32 %s531_s16, %s674_s19  ;;  %p27_p3 = scmp.ge.s32.totalorder %s676_s20, 2 }
   0x9   : > { %p416_p4 = scmp.ge.s32.totalorder %s539_s18, 1  ;;  %p607_p5 = por %p129_p2, %p128_p1 }
   0xa   : > { %p186_p6 = scmp.lt.s32.totalorder %s539_s18, 5  ;;  %s678_s20 = smov (%p27_p3, %s676_s20), 0 }
   0xb   : > { %s113_s24 = ssub.s32 %s535_s17, %s678_s20  ;;  %s118_s26 = sadd.s32 1, %s519_s13 }
   0xc   : > { %p187_p7 = pnand %p416_p4, %p186_p6  ;;  %s115_s25 = sor.u32 %s114_s22, %s113_s24 }
   0xd   : > { %p116_p8 = scmp.eq.s32.totalorder %s115_s25, 0  ;;  %s225_s28 = sand.u32 (!%p187_p7), 1, %s515_s12  }
   0xe   : > { %190 = sbr.rel (%p187_p7) target bundleno = 37 (0x25), region = 32  ;;  %p228_p9 = scmp.lt.s32.totalorder (!%p187_p7), %s527_s15, 1 }
   0xf   : > { %s618_s27 = scalar_select %p116_p8, %s519_s13, %s118_s26  }
  0x10   : > { %p230_p10 = scmp.lt.s32.totalorder (!%p187_p7), %s523_s14, 1  ;;  %s417_s29 = sshll.u32 (!%p187_p7), %s225_s28, 4 }
  0x11   : > { %s227_s25 = scalar_lea.vmem (!%p187_p7), [#allocation2], %s417_s29 }
  0x13   : > { %s229_s30 = scalar_select %p228_p9, %s527_s15, 1 }
  0x14   : > { %s231_s4 = scalar_select %p230_p10, %s523_s14, 1 }
  0x15   : > { %s418_s5 = sshll.u32 %s229_s30, 1 }
  0x16   : > { %s233_s6 = sadd.s32 %s418_s5, %s231_s4  ;;  %s425_s4 = sshll.u32 (%p607_p5), %s527_s15, 2 }
  0x17   : > { %s419_s7 = sshll.u32 %s233_s6, 2  ;;  %s421_s8 = sshll.u32 %s233_s6, 3 }
  0x18   : > { %s235_s11 = scalar_lea.vmem %s662_s0, %s419_s7  ;;  %s243_s24 = scalar_lea.vmem %s663_s1, %s421_s8 }
  0x19   : > { %v252_v0 = vld [vmem:[%s235_s11] sm:$0xf]  ;;  %s423_s12 = sshll.u32 %s233_s6, 1  ;;  %264 = sbr.rel (!%p607_p5) target bundleno = 37 (0x25), region = 36 }
  0x1a   : > { %v254_v1 = vld [vmem:[%s243_s24] sm:$0x3f]  ;;  %253 = vst [vmem:[%s227_s25] sm:$0xf] %v252_v0  ;;  %s251_s30 = scalar_lea.vmem %s664_s2, %s423_s12  ;;  %s266_s5 = sadd.s32 (%p607_p5), %s523_s14, %s425_s4 }
  0x1b   : > { %255 = vst [vmem:[%s227_s25 + $0x4] sm:$0x3f] %v254_v1  ;;  %v256_v2 = vld [vmem:[%s251_s30] sm:$0x3]  ;;  %s426_s7 = sshll.u32 (%p607_p5), %s266_s5, 3 }
  0x1c   : > { %257 = vst [vmem:[%s227_s25 + $0xa] sm:$0x3] %v256_v2  ;;  %s268_s8 = scalar_lea.vmem (%p607_p5), %s665_s3, %s426_s7 }
  0x22   : > { %v299_v3 = vld [vmem:[%s227_s25] sm:$0xff] }
  0x23   : > { %v301_v4 = vld [vmem:[%s227_s25 + $0x8] sm:$0xff]  ;;  %300 = vst [vmem:[%s268_s8] sm:$0xff] %v299_v3 }
  0x24   : > { %302 = vst [vmem:[%s268_s8 + $0x10] sm:$0xff] %v301_v4 }
  0x25 PF: > { %s13_s18 = sadd.s32 1, %s539_s18   ;;  %s667_s12 = smov %s519_s13 }
  0x26   : > { %p10_p11 = scmp.ge.s32.totalorder %s13_s18, 6   ;;  %s668_s13 = smov %s618_s27 }
  0x27   : > { %s669_s14 = smov %s531_s16  ;;  %s670_s15 = smov %s535_s17 }
  0x28   : > { %s671_s16 = smov %s674_s19  ;;  %s672_s17 = smov %s678_s20 }
  0x29   :  { %12 = sbr.rel (!%p10_p11) target bundleno = 4 (0x4), region = 106 }

</bundles_post_ra>
